<compile_context>
chip_gen: v6e
topology: v6e:2x2x1
jax: 0.10.0
libtpu: 0.0.40
codegen_flags: <defaults>
</compile_context>

<pallas_src>
import jax
import jax.numpy as jnp
from jax.experimental import pallas as pl
from jax.experimental.pallas import tpu as pltpu

LANE = 128            # vreg lane width: hidden feature dims are padded to multiples of this
MAX_BATCH_TILE = 2048


def _round_up(x, m):
    return (x + m - 1) // m * m


def _sublane_gran(dtype):
    # native sublane packing: f32 -> 8 rows, bf16 -> 16, int8/fp8 -> 32
    return max(8, 32 // jnp.dtype(dtype).itemsize)


def _pad2d(a, rows, cols):
    r, c = a.shape
    if (r, c) == (rows, cols):
        return a
    return jnp.pad(a, ((0, rows - r), (0, cols - c)))


# ----------------------------------------------------------------------------- kernel


def mlp_kernel(x_ref, w1_ref, b1_ref, w2_ref, b2_ref, w3_ref, b3_ref,
               w4_ref, b4_ref, o_ref):
    """Whole 4-layer MLP fused over one batch tile.

    Matmuls hit the MXU with f32 accumulation; bias-add + ReLU run on the VPU.
    Dropout is an eval-mode identity and intentionally absent.
    """
    mxu_dtype = w1_ref.dtype                               # bf16 (default) or f32
    h = x_ref[...].astype(mxu_dtype)                       # cast in-kernel: no extra HBM pass

    h = jnp.dot(h, w1_ref[...], preferred_element_type=jnp.float32) + b1_ref[...]
    h = jnp.maximum(h, 0.0).astype(mxu_dtype)              # relu1 (+ dropout no-op)

    h = jnp.dot(h, w2_ref[...], preferred_element_type=jnp.float32) + b2_ref[...]
    h = jnp.maximum(h, 0.0).astype(mxu_dtype)              # relu2 (+ dropout no-op)

    h = jnp.dot(h, w3_ref[...], preferred_element_type=jnp.float32) + b3_ref[...]
    h = jnp.maximum(h, 0.0).astype(mxu_dtype)              # relu3

    h = jnp.dot(h, w4_ref[...], preferred_element_type=jnp.float32) + b4_ref[...]
    o_ref[...] = h.astype(o_ref.dtype)                     # fc4 (no activation), narrow store


# ----------------------------------------------------------------------------- helpers


_BUFFERED_ONE_OK = None


def _buffered_one_supported():
    """One-time probe: does this jax version accept pipeline_mode=pl.Buffered(1)?"""
    global _BUFFERED_ONE_OK
    if _BUFFERED_ONE_OK is not None:
        return _BUFFERED_ONE_OK
    try:
        def _probe(w_ref, o_ref):
            o_ref[...] = w_ref[...] + 1.0

        fn = pl.pallas_call(
            _probe,
            out_shape=jax.ShapeDtypeStruct((8, 128), jnp.float32),
            grid=(2,),
            in_specs=[pl.BlockSpec((8, 128), lambda i: (0, 0),
                                   pipeline_mode=pl.Buffered(1))],
            out_specs=pl.BlockSpec((8, 128), lambda i: (0, 0)),
        )
        jax.block_until_ready(fn(jnp.zeros((8, 128), jnp.float32)))
        _BUFFERED_ONE_OK = True
    except Exception:
        _BUFFERED_ONE_OK = False
    return _BUFFERED_ONE_OK


def _default_vmem_limit_bytes():
    phys = 64 * 1024 * 1024          # conservative default if query fails
    try:
        phys = int(getattr(pltpu.get_tpu_info(), "vmem_capacity_bytes", phys))
    except Exception:
        pass
    if phys <= 64 * 1024 * 1024:     # v7x-class: 64 MiB per TensorCore
        return int(phys * 0.85)
    return min(112 * 1024 * 1024, int(phys * 0.85))   # v5e/v6e: 128 MiB physical


def _pick_batch_tile(B, cap_rows, gran):
    b_up = _round_up(B, gran)
    tile = min(max(cap_rows, gran), MAX_BATCH_TILE, b_up)
    tile = max(gran, (tile // gran) * gran)
    # Target >= 4 grid steps when there is enough work: with the batch axis marked
    # "parallel", v7x shards it across 2 TensorCores, so 4 steps gives each TC >= 2 steps
    # and keeps x/out DMA double-buffered.  No effect on single-TC v5e/v6e beyond pipelining.
    if b_up >= 4 * gran:
        tile = min(tile, max(gran, (b_up // 4) // gran * gran))
    return tile


# ----------------------------------------------------------------------------- params


def prepare_params(params, *, compute_dtype=jnp.bfloat16):
    """Pad hidden feature dims to multiples of 128 lanes and cast weights to the MXU compute
    dtype ONCE (not per forward call).  Zero padding is mathematically exact through ReLU.

    The fc1 input (K) dim and the fc4 output (N) dim are left unpadded so x can be consumed
    as-is and the kernel writes a narrow (B, D_out) output with no wrapper-side slicing.
    Weight layout is [in, out]; biases are [1, out] f32."""
    ws = [params[f"w{i}"] for i in range(1, 5)]
    bs = [params[f"b{i}"].reshape(1, -1) for i in range(1, 5)]
    d_in = ws[0].shape[0]
    d_out = ws[3].shape[1]
    h1p, h2p, h3p = (_round_up(w.shape[1], LANE) for w in ws[:3])
    in_dims = [d_in, h1p, h2p, h3p]
    out_dims = [h1p, h2p, h3p, d_out]
    cd = jnp.dtype(compute_dtype)
    prep = {}
    for k in range(4):
        prep[f"w{k + 1}"] = _pad2d(ws[k], in_dims[k], out_dims[k]).astype(cd)
        prep[f"b{k + 1}"] = _pad2d(bs[k], 1, out_dims[k]).astype(jnp.float32)
    return prep


# ----------------------------------------------------------------------------- forward


def simple_mlp_forward(x, prep, *, batch_tile=None, out_dtype=None, vmem_limit_bytes=None):
    """x: [B, input_dim] (any float dtype).  prep: output of prepare_params()."""
    B, d_in = x.shape
    ws = [prep[f"w{i}"] for i in range(1, 5)]
    bs = [prep[f"b{i}"] for i in range(1, 5)]
    assert ws[0].shape[0] == d_in, "x feature dim must match prepared fc1 weight"
    d_out = ws[3].shape[1]
    compute_dtype = ws[0].dtype
    out_dtype = jnp.dtype(out_dtype) if out_dtype is not None else jnp.dtype(x.dtype)

    flat_wb = []
    for wi, bi in zip(ws, bs):
        flat_wb += [wi, bi]

    if vmem_limit_bytes is None:
        vmem_limit_bytes = _default_vmem_limit_bytes()

    weight_bufs = 1 if _buffered_one_supported() else 2
    gran = max(_sublane_gran(x.dtype), _sublane_gran(out_dtype), _sublane_gran(compute_dtype))

    if batch_tile is None:
        xb = jnp.dtype(x.dtype).itemsize
        ob = out_dtype.itemsize
        cb = jnp.dtype(compute_dtype).itemsize
        weight_bytes = sum(int(a.size) * a.dtype.itemsize for a in flat_wb)
        widths = [w.shape[1] for w in ws]              # [H1p, H2p, H3p, D_out]
        # Only adjacent intermediates are live simultaneously (the compiler reuses VMEM for
        # the earlier hiddens): worst adjacent pair of (f32 accum + compute-dtype cast) of
        # layer i plus the f32 accum of layer i+1, plus x's in-kernel compute-dtype copy.
        live = max(widths[i] * (4 + cb) + widths[i + 1] * 4 for i in range(3))
        per_row = 2 * d_in * xb + 2 * d_out * ob + d_in * cb + live
        budget = int(vmem_limit_bytes * 0.8) - weight_bufs * weight_bytes
        cap_rows = (max(budget, 0) // per_row) // gran * gran
        batch_tile = _pick_batch_tile(B, cap_rows, gran)
        # TODO(synk): if resident padded weights alone exceed the budget (huge H on v7x's
        # 64 MiB VMEM), tile fc1 over its N dim on a second grid axis (or split into two
        # pallas_calls) instead of degrading to a tiny batch tile.
    assert batch_tile % gran == 0, f"batch_tile must be a multiple of {gran} for these dtypes"

    grid = (pl.cdiv(B, batch_tile),)   # partial last block handled by Pallas (OOB rows dropped)

    pipeline_mode = pl.Buffered(1) if weight_bufs == 1 else None

    def _resident_spec(a):
        # Weights/biases: constant block index across the grid -> resident in VMEM;
        # single-buffer them when supported to reclaim VMEM for a larger batch tile.
        if pipeline_mode is None:
            return pl.BlockSpec(a.shape, lambda i: (0, 0))
        return pl.BlockSpec(a.shape, lambda i: (0, 0), pipeline_mode=pipeline_mode)

    k_dims = [d_in] + [w.shape[1] for w in ws[:3]]
    n_dims = [w.shape[1] for w in ws]
    flops = 2 * int(B) * sum(int(k) * int(n) for k, n in zip(k_dims, n_dims))
    bytes_accessed = (int(x.size) * jnp.dtype(x.dtype).itemsize
                      + sum(int(a.size) * a.dtype.itemsize for a in flat_wb)
                      + int(B) * int(d_out) * out_dtype.itemsize)
    cost = pl.CostEstimate(flops=flops, transcendentals=0, bytes_accessed=bytes_accessed)

    return pl.pallas_call(
        mlp_kernel,
        out_shape=jax.ShapeDtypeStruct((B, d_out), out_dtype),
        grid=grid,
        in_specs=[pl.BlockSpec((batch_tile, d_in), lambda i: (i, 0))]
                 + [_resident_spec(a) for a in flat_wb],
        out_specs=pl.BlockSpec((batch_tile, d_out), lambda i: (i, 0)),
        compiler_params=pltpu.CompilerParams(
            dimension_semantics=("parallel",),
            vmem_limit_bytes=int(vmem_limit_bytes)),
        cost_estimate=cost,
    )(x, *flat_wb)


# ----------------------------------------------------------------------------- reference


def init_params(key, input_dim, hidden_dim, output_dim):
    """Deterministic init matching SimpleMLP layer shapes.
    Linear weights created as [out, in] (PyTorch convention) then transposed to [in, out]."""
    dims = [
        (input_dim, hidden_dim),
        (hidden_dim, hidden_dim // 4),
        (hidden_dim // 4, hidden_dim // 8),
        (hidden_dim // 8, output_dim),
    ]
    params = {}
    for idx, (fan_in, fan_out) in enumerate(dims, start=1):
        key, kw, kb = jax.random.split(key, 3)
        bound = 1.0 / jnp.sqrt(fan_in)
        w_pt = jax.random.uniform(kw, (fan_out, fan_in), jnp.float32, -bound, bound)
        b_pt = jax.random.uniform(kb, (fan_out,), jnp.float32, -bound, bound)
        params[f"w{idx}"] = jnp.transpose(w_pt)            # [in, out]
        params[f"b{idx}"] = b_pt.reshape(1, fan_out)       # [1, out]
    return params


def reference_forward(x, params):
    h = jnp.maximum(x @ params["w1"] + params["b1"], 0.0)
    h = jnp.maximum(h @ params["w2"] + params["b2"], 0.0)
    h = jnp.maximum(h @ params["w3"] + params["b3"], 0.0)
    return h @ params["w4"] + params["b4"]


if __name__ == "__main__":
    key = jax.random.PRNGKey(0)
    batch, input_dim, hidden_dim, output_dim = 16, 32, 32, 4

    key, kx, kp, kr = jax.random.split(key, 4)
    x = jax.random.normal(kx, (batch, input_dim), jnp.float32)
    params = init_params(kp, input_dim, hidden_dim, output_dim)
    ref = reference_forward(x, params)

    # f32 compute path: exact-semantics check (zero padding is exact through ReLU).
    prep_f32 = prepare_params(params, compute_dtype=jnp.float32)
    out_f32 = jax.block_until_ready(simple_mlp_forward(x, prep_f32))
    assert out_f32.shape == (batch, output_dim)
    assert jnp.allclose(out_f32, ref, atol=1e-4, rtol=1e-4), "f32 kernel mismatch vs reference"

    # Default bf16 MXU path (f32 accumulation, f32 output): loose-tolerance check.
    prep_bf16 = prepare_params(params)                     # compute_dtype=bfloat16 (default)
    out_bf16 = jax.block_until_ready(simple_mlp_forward(x, prep_bf16))
    assert out_bf16.shape == (batch, output_dim)
    assert out_bf16.dtype == x.dtype
    assert jnp.allclose(out_bf16, ref, atol=8e-2, rtol=8e-2), \
        "bf16-compute kernel drifted too far from reference"

    # Ragged batch: partial last grid block (no wrapper-side row padding).
    x_ragged = jax.random.normal(kr, (20, input_dim), jnp.float32)
    ref_ragged = reference_forward(x_ragged, params)
    out_ragged = jax.block_until_ready(
        simple_mlp_forward(x_ragged, prep_f32, batch_tile=16))
    assert out_ragged.shape == (20, output_dim)
    assert jnp.allclose(out_ragged, ref_ragged, atol=1e-4, rtol=1e-4), \
        "ragged-batch (partial block) kernel mismatch vs reference"

    print("KERNEL_OK")
</pallas_src>

<mosaic_0001>
module attributes {stable_mosaic.version = 11 : i64} {
  func.func @_probe(%arg0: i32, %arg1: memref<8x128xf32, #tpu.memory_space<vmem>>, %arg2: memref<8x128xf32, #tpu.memory_space<vmem>>) attributes {dimension_semantics = [#tpu.dimension_semantics<arbitrary>], iteration_bounds = array<i64: 2>, scalar_prefetch = 0 : i64, scratch_operands = 0 : i64, tpu.core_type = #tpu.core_type<tc>, window_params = [{pipeline_mode = #tpu.pipeline_mode<synchronous>, transform_indices = @transform_0, window_bounds = array<i64: 8, 128>}, {pipeline_mode = #tpu.pipeline_mode<synchronous>, transform_indices = @transform_1, window_bounds = array<i64: 8, 128>}]} {
    %c0 = arith.constant 0 : index
    %c0_0 = arith.constant 0 : index
    %0 = vector.load %arg1[%c0, %c0_0] : memref<8x128xf32, #tpu.memory_space<vmem>>, vector<8x128xf32>
    %cst = arith.constant 1.000000e+00 : f32
    %1 = vector.broadcast %cst : f32 to vector<8x128xf32>
    %2 = arith.addf %0, %1 : vector<8x128xf32>
    %c0_1 = arith.constant 0 : index
    %c0_2 = arith.constant 0 : index
    %3 = vector.load %arg2[%c0_1, %c0_2] : memref<8x128xf32, #tpu.memory_space<vmem>>, vector<8x128xf32>
    tpu.vector_store %arg2[%c0_1, %c0_2], %2 {strides = array<i32>} : memref<8x128xf32, #tpu.memory_space<vmem>>, vector<8x128xf32>,
    return
  }
  func.func @transform_0(%arg0: i32) -> (i32, i32) {
    %c0_i32 = arith.constant 0 : i32
    %c0_i32_0 = arith.constant 0 : i32
    %c0_i32_1 = arith.constant 0 : i32
    return %c0_i32, %c0_i32_0 : i32, i32
  }
  func.func @transform_1(%arg0: i32) -> (i32, i32) {
    %c0_i32 = arith.constant 0 : i32
    %c0_i32_0 = arith.constant 0 : i32
    %c0_i32_1 = arith.constant 0 : i32
    return %c0_i32, %c0_i32_0 : i32, i32
  }
}

module attributes {stable_mosaic.version = 11 : i64} {
  func.func @mlp_kernel(%arg0: i32, %arg1: memref<16x32xf32, #tpu.memory_space<vmem>>, %arg2: memref<32x128xf32, #tpu.memory_space<vmem>>, %arg3: memref<1x128xf32, #tpu.memory_space<vmem>>, %arg4: memref<128x128xf32, #tpu.memory_space<vmem>>, %arg5: memref<1x128xf32, #tpu.memory_space<vmem>>, %arg6: memref<128x128xf32, #tpu.memory_space<vmem>>, %arg7: memref<1x128xf32, #tpu.memory_space<vmem>>, %arg8: memref<128x4xf32, #tpu.memory_space<vmem>>, %arg9: memref<1x4xf32, #tpu.memory_space<vmem>>, %arg10: memref<16x4xf32, #tpu.memory_space<vmem>>) attributes {dimension_semantics = [#tpu.dimension_semantics<parallel>], iteration_bounds = array<i64: 1>, scalar_prefetch = 0 : i64, scratch_operands = 0 : i64, tpu.core_type = #tpu.core_type<tc>, window_params = [{transform_indices = @transform_0, window_bounds = array<i64: 16, 32>}, {pipeline_mode = #tpu.pipeline_mode<synchronous>, transform_indices = @transform_1, window_bounds = array<i64: 32, 128>}, {pipeline_mode = #tpu.pipeline_mode<synchronous>, transform_indices = @transform_2, window_bounds = array<i64: 1, 128>}, {pipeline_mode = #tpu.pipeline_mode<synchronous>, transform_indices = @transform_3, window_bounds = array<i64: 128, 128>}, {pipeline_mode = #tpu.pipeline_mode<synchronous>, transform_indices = @transform_4, window_bounds = array<i64: 1, 128>}, {pipeline_mode = #tpu.pipeline_mode<synchronous>, transform_indices = @transform_5, window_bounds = array<i64: 128, 128>}, {pipeline_mode = #tpu.pipeline_mode<synchronous>, transform_indices = @transform_6, window_bounds = array<i64: 1, 128>}, {pipeline_mode = #tpu.pipeline_mode<synchronous>, transform_indices = @transform_7, window_bounds = array<i64: 128, 4>}, {pipeline_mode = #tpu.pipeline_mode<synchronous>, transform_indices = @transform_8, window_bounds = array<i64: 1, 4>}, {transform_indices = @transform_9, window_bounds = array<i64: 16, 4>}]} {
    %c0 = arith.constant 0 : index
    %c0_0 = arith.constant 0 : index
    %0 = vector.load %arg1[%c0, %c0_0] : memref<16x32xf32, #tpu.memory_space<vmem>>, vector<16x32xf32>
    %c0_1 = arith.constant 0 : index
    %c0_2 = arith.constant 0 : index
    %1 = vector.load %arg2[%c0_1, %c0_2] : memref<32x128xf32, #tpu.memory_space<vmem>>, vector<32x128xf32>
    %cst = arith.constant dense<0.000000e+00> : vector<16x128xf32>
    %2 = tpu.matmul %0, %1, %cst {dimension_numbers = #tpu.dot_dimension_numbers<[1], [0], [0], [1], [0, 0, 1, 1], [], []>} : vector<16x32xf32>, vector<32x128xf32>, vector<16x128xf32> -> vector<16x128xf32>
    %c0_3 = arith.constant 0 : index
    %c0_4 = arith.constant 0 : index
    %3 = vector.load %arg3[%c0_3, %c0_4] : memref<1x128xf32, #tpu.memory_space<vmem>>, vector<1x128xf32>
    %4 = vector.broadcast %3 : vector<1x128xf32> to vector<16x128xf32>
    %5 = arith.addf %2, %4 : vector<16x128xf32>
    %cst_5 = arith.constant 0.000000e+00 : f32
    %6 = vector.broadcast %cst_5 : f32 to vector<16x128xf32>
    %7 = arith.maximumf %5, %6 : vector<16x128xf32>
    %c0_6 = arith.constant 0 : index
    %c0_7 = arith.constant 0 : index
    %8 = vector.load %arg4[%c0_6, %c0_7] : memref<128x128xf32, #tpu.memory_space<vmem>>, vector<128x128xf32>
    %cst_8 = arith.constant dense<0.000000e+00> : vector<16x128xf32>
    %9 = tpu.matmul %7, %8, %cst_8 {dimension_numbers = #tpu.dot_dimension_numbers<[1], [0], [0], [1], [0, 0, 1, 1], [], []>} : vector<16x128xf32>, vector<128x128xf32>, vector<16x128xf32> -> vector<16x128xf32>
    %c0_9 = arith.constant 0 : index
    %c0_10 = arith.constant 0 : index
    %10 = vector.load %arg5[%c0_9, %c0_10] : memref<1x128xf32, #tpu.memory_space<vmem>>, vector<1x128xf32>
    %11 = vector.broadcast %10 : vector<1x128xf32> to vector<16x128xf32>
    %12 = arith.addf %9, %11 : vector<16x128xf32>
    %cst_11 = arith.constant 0.000000e+00 : f32
    %13 = vector.broadcast %cst_11 : f32 to vector<16x128xf32>
    %14 = arith.maximumf %12, %13 : vector<16x128xf32>
    %c0_12 = arith.constant 0 : index
    %c0_13 = arith.constant 0 : index
    %15 = vector.load %arg6[%c0_12, %c0_13] : memref<128x128xf32, #tpu.memory_space<vmem>>, vector<128x128xf32>
    %cst_14 = arith.constant dense<0.000000e+00> : vector<16x128xf32>
    %16 = tpu.matmul %14, %15, %cst_14 {dimension_numbers = #tpu.dot_dimension_numbers<[1], [0], [0], [1], [0, 0, 1, 1], [], []>} : vector<16x128xf32>, vector<128x128xf32>, vector<16x128xf32> -> vector<16x128xf32>
    %c0_15 = arith.constant 0 : index
    %c0_16 = arith.constant 0 : index
    %17 = vector.load %arg7[%c0_15, %c0_16] : memref<1x128xf32, #tpu.memory_space<vmem>>, vector<1x128xf32>
    %18 = vector.broadcast %17 : vector<1x128xf32> to vector<16x128xf32>
    %19 = arith.addf %16, %18 : vector<16x128xf32>
    %cst_17 = arith.constant 0.000000e+00 : f32
    %20 = vector.broadcast %cst_17 : f32 to vector<16x128xf32>
    %21 = arith.maximumf %19, %20 : vector<16x128xf32>
    %c0_18 = arith.constant 0 : index
    %c0_19 = arith.constant 0 : index
    %22 = vector.load %arg8[%c0_18, %c0_19] : memref<128x4xf32, #tpu.memory_space<vmem>>, vector<128x4xf32>
    %cst_20 = arith.constant dense<0.000000e+00> : vector<16x4xf32>
    %23 = tpu.matmul %21, %22, %cst_20 {dimension_numbers = #tpu.dot_dimension_numbers<[1], [0], [0], [1], [0, 0, 1, 1], [], []>} : vector<16x128xf32>, vector<128x4xf32>, vector<16x4xf32> -> vector<16x4xf32>
    %c0_21 = arith.constant 0 : index
    %c0_22 = arith.constant 0 : index
    %24 = vector.load %arg9[%c0_21, %c0_22] : memref<1x4xf32, #tpu.memory_space<vmem>>, vector<1x4xf32>
    %25 = vector.broadcast %24 : vector<1x4xf32> to vector<16x4xf32>
    %26 = arith.addf %23, %25 : vector<16x4xf32>
    %c0_23 = arith.constant 0 : index
    %c0_24 = arith.constant 0 : index
    %27 = vector.load %arg10[%c0_23, %c0_24] : memref<16x4xf32, #tpu.memory_space<vmem>>, vector<16x4xf32>
    tpu.vector_store %arg10[%c0_23, %c0_24], %26 {strides = array<i32>} : memref<16x4xf32, #tpu.memory_space<vmem>>, vector<16x4xf32>,
    return
  }
  func.func @transform_0(%arg0: i32) -> (i32, i32) {
    %c0_i32 = arith.constant 0 : i32
    %c0_i32_0 = arith.constant 0 : i32
    return %arg0, %c0_i32 : i32, i32
  }
  func.func @transform_1(%arg0: i32) -> (i32, i32) {
    %c0_i32 = arith.constant 0 : i32
    %c0_i32_0 = arith.constant 0 : i32
    %c0_i32_1 = arith.constant 0 : i32
    return %c0_i32, %c0_i32_0 : i32, i32
  }
  func.func @transform_2(%arg0: i32) -> (i32, i32) {
    %c0_i32 = arith.constant 0 : i32
    %c0_i32_0 = arith.constant 0 : i32
    %c0_i32_1 = arith.constant 0 : i32
    return %c0_i32, %c0_i32_0 : i32, i32
  }
  func.func @transform_3(%arg0: i32) -> (i32, i32) {
    %c0_i32 = arith.constant 0 : i32
    %c0_i32_0 = arith.constant 0 : i32
    %c0_i32_1 = arith.constant 0 : i32
    return %c0_i32, %c0_i32_0 : i32, i32
  }
  func.func @transform_4(%arg0: i32) -> (i32, i32) {
    %c0_i32 = arith.constant 0 : i32
    %c0_i32_0 = arith.constant 0 : i32
    %c0_i32_1 = arith.constant 0 : i32
    return %c0_i32, %c0_i32_0 : i32, i32
  }
  func.func @transform_5(%arg0: i32) -> (i32, i32) {
    %c0_i32 = arith.constant 0 : i32
    %c0_i32_0 = arith.constant 0 : i32
    %c0_i32_1 = arith.constant 0 : i32
    return %c0_i32, %c0_i32_0 : i32, i32
  }
  func.func @transform_6(%arg0: i32) -> (i32, i32) {
    %c0_i32 = arith.constant 0 : i32
    %c0_i32_0 = arith.constant 0 : i32
    %c0_i32_1 = arith.constant 0 : i32
    return %c0_i32, %c0_i32_0 : i32, i32
  }
  func.func @transform_7(%arg0: i32) -> (i32, i32) {
    %c0_i32 = arith.constant 0 : i32
    %c0_i32_0 = arith.constant 0 : i32
    %c0_i32_1 = arith.constant 0 : i32
    return %c0_i32, %c0_i32_0 : i32, i32
  }
  func.func @transform_8(%arg0: i32) -> (i32, i32) {
    %c0_i32 = arith.constant 0 : i32
    %c0_i32_0 = arith.constant 0 : i32
    %c0_i32_1 = arith.constant 0 : i32
    return %c0_i32, %c0_i32_0 : i32, i32
  }
  func.func @transform_9(%arg0: i32) -> (i32, i32) {
    %c0_i32 = arith.constant 0 : i32
    %c0_i32_0 = arith.constant 0 : i32
    return %arg0, %c0_i32 : i32, i32
  }
}

</mosaic_0001>

<bundles_post_ra>
// kernel: tpu_custom_call.1
= control target key start
LH: loop header
LB: loop body
LE: loop exit
PB: predicated region body
PF: predicated region fallthrough
CT: control target
= control target key end

     0   :  { %6 = vsyncpa [#allocation3], 0  ;;  %s305_s0 = inlined_call_operand.hbm [shape: f32[8,128], index: 0, kind: input, shape index: {}]   ;;  %s306_s1 = inlined_call_operand.hbm [shape: f32[8,128], index: 1, kind: output, shape index: {}]  }
   0x1   :  { %7 = vsyncpa [#allocation4], 0  ;;  %s258_s6 = smov 0  }
   0x2 LB: > { %s145_s7 = sadd.s32 4294967295, %s244_s6   ;;  %p146_p0 = scmp.ge.s32.totalorder %s244_s6, 1  ;;  %s244_s6 = sphi %s258_s6, %s13_s6  }
   0x3   : > { %p60_p1 = scmp.lt.s32.totalorder %s244_s6, 3  ;;  %p270_p3 = scmp.eq.s32.totalorder %s145_s7, 0 }
   0x4   : > { %s246_s10 = smov [#allocation2]  }
   0x5   : > { %p266_p2 = pnand %p146_p0, %p60_p1  ;;  %s73_s11 = sshll.u32 %s246_s10, 4  ;;  %s74_s11 = int_to_ptr.vmem [resolvable:$true] %s73_s11 }
   0x6   : > { %s191_s12 = scalar_lea.vmem %s74_s11, 128  ;;  %p199_p10 = scmp.lt.s32.totalorder %s74_s11, %s74_s11 }
   0x7   : > { %p162_p4 = pneg %p266_p2  ;;  %p192_p7 = scmp.ne.s32.totalorder %s74_s11, %s191_s12 }
   0x8   : > { %p200_p11 = scmp.lt.s32.totalorder %s191_s12, %s191_s12 }
   0x9   : > { %p163_p5 = pnand %p270_p3, %p162_p4 }
   0xa   : > { %p201_p12 = por %p200_p11, %p199_p10 }
   0xb   : > { %p182_p6 = pneg %p163_p5 }
   0xd   : > { %p194_p8 = pnand %p192_p7, %p182_p6 }
   0xf   : > { %p195_p9 = pneg %p194_p8 }
  0x11   : > { %p202_p13 = pnand %p201_p12, %p195_p9 }
  0x13   : > { %205 = shalt.err (!%p202_p13)
}
  0x14   : > { %165 = dma.hbm_to_vmem [thread:$0]  (!%p163_p5), %s305_s0, 128, %s74_s11, [#allocation3]  }
  0x15   : > { %86 = sbr.rel (%p266_p2) target bundleno = 42 (0x2a), region = 24 }
  0x1a   : > { %235 = dma.done.wait (%p270_p3), [#allocation3], 128  }
  0x1b   : > { %237 = vsyncadd (%p270_p3), [#allocation3], 4294967168  ;;  %s247_s15 = smov [#allocation5]   ;;  %v96_v0 = vld [vmem:[#allocation2] sm:$0xff]  ;;  %p287_p0 = scmp.eq.s32.totalorder %s145_s7, 1 }
  0x1c   : > { %s106_s16 = sshll.u32 %s247_s15, 4  ;;  %v97_v1 = vadd.f32 1.0, %v96_v0  ;;  %s107_s16 = int_to_ptr.vmem [resolvable:$true] %s106_s16 }
  0x1d   : > { %s206_s18 = scalar_lea.vmem %s107_s16, 128  ;;  %p213_p5 = scmp.lt.s32.totalorder %s107_s16, %s107_s16 }
  0x1e   : > { %98 = vst [vmem:[#allocation5] sm:$0xff] %v97_v1  ;;  %p207_p1 = scmp.ne.s32.totalorder %s107_s16, %s206_s18  ;;  %p214_p6 = scmp.lt.s32.totalorder %s206_s18, %s206_s18 }
  0x20   : > { %p208_p2 = pnand %p207_p1, %p287_p0  ;;  %p215_p7 = por %p214_p6, %p213_p5 }
  0x22   : > { %p209_p4 = pneg %p208_p2 }
  0x24   : > { %p216_p3 = pnand %p215_p7, %p209_p4 }
  0x26   : > { %219 = shalt.err (!%p216_p3)
}
  0x27   : > { %159 = dma.vmem_to_hbm [thread:$0]  (%p287_p0), %s107_s16, 128, %s306_s1, [#allocation4]  }
  0x28   : > { %239 = dma.done.wait (%p287_p0), [#allocation4], 128  }
  0x29   : > { %241 = vsyncadd (%p287_p0), [#allocation4], 4294967168 }
  0x2a PF: > { %s13_s6 = sadd.s32 1, %s244_s6  }
  0x2b   : > { %p10_p8 = scmp.ge.s32.totalorder %s13_s6, 4  }
  0x2d   :  { %12 = sbr.rel (!%p10_p8) target bundleno = 2 (0x2), region = 53 }
  0x32   :  { %119 = vsyncpa [#allocation3], 1 }
  0x33   :  { %121 = vsyncpa [#allocation3 + $0x1], 1 }
  0x34   :  { %122 = vsyncpa [#allocation4], 1 }
  0x35   :  { %124 = vsyncpa [#allocation4 + $0x1], 1 }

// kernel: tpu_custom_call.1
= control target key start
LH: loop header
LB: loop body
LE: loop exit
PB: predicated region body
PF: predicated region fallthrough
CT: control target
= control target key end

     0   :  { %14 = vsyncpa [#allocation3], 0  ;;  %s908_s0 = inlined_call_operand.hbm [shape: f32[16,32], index: 0, kind: input, shape index: {}]   ;;  %s909_s1 = inlined_call_operand.hbm [shape: f32[32,128], index: 1, kind: input, shape index: {}]   ;;  %s910_s2 = inlined_call_operand.vmem [shape: f32[1,128], index: 2, kind: input, shape index: {}]   ;;  %s911_s3 = inlined_call_operand.vmem [shape: f32[128,128], index: 3, kind: input, shape index: {}]   ;;  %s912_s4 = inlined_call_operand.vmem [shape: f32[1,128], index: 4, kind: input, shape index: {}]   ;;  %s913_s5 = inlined_call_operand.hbm [shape: f32[128,128], index: 5, kind: input, shape index: {}]   ;;  %s914_s6 = inlined_call_operand.vmem [shape: f32[1,128], index: 6, kind: input, shape index: {}]   ;;  %s915_s7 = inlined_call_operand.vmem [shape: f32[128,4], index: 7, kind: input, shape index: {}]   ;;  %s916_s8 = inlined_call_operand.vmem [shape: f32[1,4], index: 8, kind: input, shape index: {}]   ;;  %s917_s9 = inlined_call_operand.vmem [shape: f32[16,4], index: 9, kind: output, shape index: {}]  }
   0x1   :  { %15 = vsyncpa [#allocation5], 0  ;;  %s728_s30 = smov [#allocation4]   ;;  %s729_s11 = smov [#allocation2]  }
   0x2   :  { %s33_s10 = sshll.u32 %s728_s30, 4  ;;  %s21_s12 = sshll.u32 %s729_s11, 4  ;;  %s34_s10 = int_to_ptr.vmem [resolvable:$true] %s33_s10  ;;  %s22_s12 = int_to_ptr.vmem [resolvable:$true] %s21_s12 }
   0x3   :  { %s672_s13 = scalar_lea.vmem %s34_s10, 512  ;;  %p677_p1 = scmp.lt.s32.totalorder %s34_s10, %s34_s10 }
   0x4   :  { %p673_p0 = scmp.ne.s32.totalorder %s34_s10, %s672_s13  ;;  %p678_p2 = scmp.lt.s32.totalorder %s672_s13, %s672_s13 }
   0x6   :  { %p679_p3 = por %p678_p2, %p677_p1 }
   0x8   :  { %p680_p4 = pnand %p679_p3, %p673_p0 }
   0xa   :  { %683 = shalt.err (!%p680_p4)
}
   0xb   :  { %s730_s14 = smov 128   ;;  %s731_s15 = smov 8  }
   0xc   :  { %39 = dma.hbm_to_vmem [thread:$0]  %s909_s1, 512, %s34_s10, [#allocation5], %s730_s14, %s730_s14, %s731_s15  }
   0xd   :  { %s692_s18 = scalar_lea.vmem %s22_s12, 256  ;;  %p697_p6 = scmp.lt.s32.totalorder %s22_s12, %s22_s12 }
   0xe   :  { %p693_p5 = scmp.ne.s32.totalorder %s22_s12, %s692_s18  ;;  %p698_p7 = scmp.lt.s32.totalorder %s692_s18, %s692_s18 }
  0x10   :  { %p699_p8 = por %p698_p7, %p697_p6 }
  0x12   :  { %p700_p9 = pnand %p699_p8, %p693_p5 }
  0x14   :  { %703 = shalt.err (!%p700_p9)
}
  0x15   :  { %27 = dma.hbm_to_vmem [thread:$0]  %s908_s0, 256, %s22_s12, [#allocation3], %s730_s14, %s730_s14, %s731_s15  }
  0x16   :  { %s732_s21 = smov [#allocation6]  }
  0x17   :  { %s51_s22 = sshll.u32 %s732_s21, 4  ;;  %s52_s22 = int_to_ptr.vmem [resolvable:$true] %s51_s22 }
  0x18   :  { %s712_s23 = scalar_lea.vmem %s52_s22, 2048  ;;  %p717_p11 = scmp.lt.s32.totalorder %s52_s22, %s52_s22 }
  0x19   :  { %p713_p10 = scmp.ne.s32.totalorder %s52_s22, %s712_s23  ;;  %p718_p12 = scmp.lt.s32.totalorder %s712_s23, %s712_s23 }
  0x1b   :  { %p719_p13 = por %p718_p12, %p717_p11 }
  0x1d   :  { %p720_p0 = pnand %p719_p13, %p713_p10 }
  0x1f   :  { %723 = shalt.err (!%p720_p0)
}
  0x20   :  { %57 = dma.hbm_to_vmem [thread:$0]  %s913_s5, 2048, %s52_s22, [#allocation5], %s730_s14, %s730_s14, %s731_s15  }
  0x21   :  { %724 = dma.done.wait [#allocation3], 256  }
  0x22   :  { %725 = vsyncadd [#allocation3], 4294967040 }
  0x23   :  { %726 = dma.done.wait [#allocation5], 2560  }
  0x24   :  { %727 = vsyncadd [#allocation5], 4294964736  ;;  %vm86_vm0 = vcmask 261120   ;;  %v78_v0 = vld [vmem:[#allocation4 + $0x18] sm:$0xff]  ;;  %v77_v1 = vld [vmem:[#allocation4 + $0x10] sm:$0xff]  ;;  %vm468_vm1 = vcmask 31744  }
  0x25   :  { %543 = vmatprep.subr.mxu0 %v78_v0  ;;  %v73_v2 = vld [vmem:[#allocation2] sm:$0xff]  ;;  %v76_v3 = vld [vmem:[#allocation4 + $0x8] sm:$0xff]  ;;  %v184_v5 = vld [vmem:[%s911_s3 + $0x70] sm:$0xff] }
  0x26   :  { %544 = vmatpush3.msra.mxu0 %v78_v0  ;;  %551 = vmatprep.mubr.msk.f32.mxu0 %vm86_vm0, %v73_v2  ;;  %v185_v4 = vld [vmem:[%s911_s3 + $0x78] sm:$0xff]  ;;  %v75_v6 = vld [vmem:[#allocation4] sm:$0xff]  ;;  %v183_v7 = vld [vmem:[%s911_s3 + $0x68] sm:$0xff] }
  0x27   :  { %545 = vmatprep.subr.mxu0 %v77_v1  ;;  %554 = vmatprep.subr.mxu1 %v185_v4  ;;  %v74_v8 = vld [vmem:[#allocation2 + $0x8] sm:$0xff]  ;;  %v182_v9 = vld [vmem:[%s911_s3 + $0x60] sm:$0xff]  ;;  %v181_v10 = vld [vmem:[%s911_s3 + $0x58] sm:$0xff] }
  0x28   :  { %546 = vmatpush3.msra.mxu0 %v77_v1  ;;  %555 = vmatpush3.msra.mxu1 %v185_v4  ;;  %v180_v11 = vld [vmem:[%s911_s3 + $0x50] sm:$0xff]  ;;  %v179_v12 = vld [vmem:[%s911_s3 + $0x48] sm:$0xff]  ;;  %v178_v13 = vld [vmem:[%s911_s3 + $0x40] sm:$0xff] }
  0x29   :  { %547 = vmatprep.subr.mxu0 %v76_v3  ;;  %556 = vmatprep.subr.mxu1 %v184_v5  ;;  %v177_v14 = vld [vmem:[%s911_s3 + $0x38] sm:$0xff]  ;;  %v176_v15 = vld [vmem:[%s911_s3 + $0x30] sm:$0xff]  ;;  %v175_v16 = vld [vmem:[%s911_s3 + $0x28] sm:$0xff] }
  0x2a   :  { %548 = vmatpush3.msra.mxu0 %v76_v3  ;;  %557 = vmatpush3.msra.mxu1 %v184_v5  ;;  %v174_v17 = vld [vmem:[%s911_s3 + $0x20] sm:$0xff]  ;;  %v173_v18 = vld [vmem:[%s911_s3 + $0x18] sm:$0xff]  ;;  %v172_v19 = vld [vmem:[%s911_s3 + $0x10] sm:$0xff] }
  0x2b   :  { %549 = vmatprep.subr.mxu0 %v75_v6  ;;  %558 = vmatprep.subr.mxu1 %v183_v7  ;;  %v171_v20 = vld [vmem:[%s911_s3 + $0x8] sm:$0xff]  ;;  %v170_v21 = vld [vmem:[%s911_s3] sm:$0xff]  ;;  %v283_v24 = vld [vmem:[#allocation6 + $0x68] sm:$0xff] }
  0x2c   :  { %550 = vmatpush3.msra.mxu0 %v75_v6  ;;  %559 = vmatpush3.msra.mxu1 %v183_v7  ;;  %v285_v22 = vld [vmem:[#allocation6 + $0x78] sm:$0xff]  ;;  %v284_v23 = vld [vmem:[#allocation6 + $0x70] sm:$0xff]  ;;  %v282_v25 = vld [vmem:[#allocation6 + $0x60] sm:$0xff] }
  0x2d   :  { %552 = vmatmul.mubr.msk.f32.vlgmr.msra.gmra.mxu0 %vm86_vm0, %v74_v8  ;;  %560 = vmatprep.subr.mxu1 %v182_v9  ;;  %v281_v26 = vld [vmem:[#allocation6 + $0x58] sm:$0xff]  ;;  %v280_v27 = vld [vmem:[#allocation6 + $0x50] sm:$0xff]  ;;  %v279_v28 = vld [vmem:[#allocation6 + $0x48] sm:$0xff] }
  0x2e   :  { %561 = vmatpush3.msra.mxu1 %v182_v9  ;;  %589 = vmatprep.subr.mxu0 %v285_v22  ;;  %v278_v29 = vld [vmem:[#allocation6 + $0x40] sm:$0xff]  ;;  %v277_v30 = vld [vmem:[#allocation6 + $0x38] sm:$0xff]  ;;  %v276_v31 = vld [vmem:[#allocation6 + $0x30] sm:$0xff] }
  0x2f   :  { %562 = vmatprep.subr.mxu1 %v181_v10  ;;  %590 = vmatpush3.msra.mxu0 %v285_v22  ;;  %v275_v32 = vld [vmem:[#allocation6 + $0x28] sm:$0xff]  ;;  %v274_v33 = vld [vmem:[#allocation6 + $0x20] sm:$0xff]  ;;  %v477_v34 = vld [vmem:[%s910_s2] ss:$0 sm:$0xff] }
  0x30   :  { %563 = vmatpush3.msra.mxu1 %v181_v10  ;;  %591 = vmatprep.subr.mxu0 %v284_v23  ;;  %v273_v41 = vld [vmem:[#allocation6 + $0x18] sm:$0xff]  ;;  %v272_v42 = vld [vmem:[#allocation6 + $0x10] sm:$0xff]  ;;  %v271_v43 = vld [vmem:[#allocation6 + $0x8] sm:$0xff] }
  0x31   :  { %564 = vmatprep.subr.mxu1 %v180_v11  ;;  %592 = vmatpush3.msra.mxu0 %v284_v23  ;;  %v270_v44 = vld [vmem:[#allocation6] sm:$0xff]  ;;  %v385_v45 = vld [vmem:[%s915_s7 + $0x78] sm:$0xff]  ;;  %v383_v47 = vld [vmem:[%s915_s7 + $0x68] sm:$0xff] }
  0x32   :  { %565 = vmatpush3.msra.mxu1 %v180_v11  ;;  %593 = vmatprep.subr.mxu0 %v283_v24  ;;  %v384_v46 = vld [vmem:[%s915_s7 + $0x70] sm:$0xff]  ;;  %v382_v48 = vld [vmem:[%s915_s7 + $0x60] sm:$0xff]  ;;  %v381_v49 = vld [vmem:[%s915_s7 + $0x58] sm:$0xff] }
  0x33   :  { %566 = vmatprep.subr.mxu1 %v179_v12  ;;  %594 = vmatpush3.msra.mxu0 %v283_v24  ;;  %v380_v50 = vld [vmem:[%s915_s7 + $0x50] sm:$0xff]  ;;  %v379_v51 = vld [vmem:[%s915_s7 + $0x48] sm:$0xff]  ;;  %v378_v52 = vld [vmem:[%s915_s7 + $0x40] sm:$0xff] }
  0x34   :  { %567 = vmatpush3.msra.mxu1 %v179_v12  ;;  %595 = vmatprep.subr.mxu0 %v282_v25  ;;  %v377_v53 = vld [vmem:[%s915_s7 + $0x38] sm:$0xff]  ;;  %v376_v54 = vld [vmem:[%s915_s7 + $0x30] sm:$0xff]  ;;  %v375_v55 = vld [vmem:[%s915_s7 + $0x28] sm:$0xff] }
  0x35   :  { %568 = vmatprep.subr.mxu1 %v178_v13  ;;  %596 = vmatpush3.msra.mxu0 %v282_v25  ;;  %v374_v56 = vld [vmem:[%s915_s7 + $0x20] sm:$0xff]  ;;  %v373_v0 = vld [vmem:[%s915_s7 + $0x18] sm:$0xff]  ;;  %v372_v1 = vld [vmem:[%s915_s7 + $0x10] sm:$0xff] }
  0x36   :  { %569 = vmatpush3.msra.mxu1 %v178_v13  ;;  %597 = vmatprep.subr.mxu0 %v281_v26  ;;  %v480_v57 = vld [vmem:[%s912_s4] ss:$0 sm:$0xff]  ;;  %v371_v2 = vld [vmem:[%s915_s7 + $0x8] sm:$0xff] }
  0x37   :  { %570 = vmatprep.subr.mxu1 %v177_v14  ;;  %598 = vmatpush3.msra.mxu0 %v281_v26  ;;  %v370_v3 = vld [vmem:[%s915_s7] sm:$0xff] }
  0x38   :  { %571 = vmatpush3.msra.mxu1 %v177_v14  ;;  %599 = vmatprep.subr.mxu0 %v280_v27  ;;  %v481_v4 = vld [vmem:[%s914_s6] ss:$0 sm:$0xff] }
  0x39   :  { %572 = vmatprep.subr.mxu1 %v176_v15  ;;  %600 = vmatpush3.msra.mxu0 %v280_v27  ;;  %v482_v11 = vld [vmem:[%s916_s8] ss:$0 sm:$0xff] }
  0x3a   :  { %573 = vmatpush3.msra.mxu1 %v176_v15  ;;  %601 = vmatprep.subr.mxu0 %v279_v28 }
  0x3b   :  { %574 = vmatprep.subr.mxu1 %v175_v16  ;;  %602 = vmatpush3.msra.mxu0 %v279_v28 }
  0x3c   :  { %575 = vmatpush3.msra.mxu1 %v175_v16  ;;  %603 = vmatprep.subr.mxu0 %v278_v29 }
  0x3d   :  { %576 = vmatprep.subr.mxu1 %v174_v17  ;;  %604 = vmatpush3.msra.mxu0 %v278_v29 }
  0x3e   :  { %577 = vmatpush3.msra.mxu1 %v174_v17  ;;  %605 = vmatprep.subr.mxu0 %v277_v30 }
  0x3f   :  { %578 = vmatprep.subr.mxu1 %v173_v18  ;;  %606 = vmatpush3.msra.mxu0 %v277_v30 }
  0x40   :  { %579 = vmatpush3.msra.mxu1 %v173_v18  ;;  %607 = vmatprep.subr.mxu0 %v276_v31 }
  0x41   :  { %580 = vmatprep.subr.mxu1 %v172_v19  ;;  %608 = vmatpush3.msra.mxu0 %v276_v31 }
  0x42   :  { %581 = vmatpush3.msra.mxu1 %v172_v19  ;;  %609 = vmatprep.subr.mxu0 %v275_v32 }
  0x43   :  { %582 = vmatprep.subr.mxu1 %v171_v20  ;;  %610 = vmatpush3.msra.mxu0 %v275_v32 }
  0x44   :  { %583 = vmatpush3.msra.mxu1 %v171_v20  ;;  %611 = vmatprep.subr.mxu0 %v274_v33 }
  0x45   :  { %584 = vmatprep.subr.mxu1 %v170_v21  ;;  %612 = vmatpush3.msra.mxu0 %v274_v33 }
  0x46   :  { %585 = vmatpush3.msra.mxu1 %v170_v21  ;;  %613 = vmatprep.subr.mxu0 %v273_v41 }
  0x47   :  { %614 = vmatpush3.msra.mxu0 %v273_v41  ;;  %624 = vmatprep.subr.mxu1 %v385_v45 }
  0x48   :  { %615 = vmatprep.subr.mxu0 %v272_v42 }
  0x49   :  { %616 = vmatpush3.msra.mxu0 %v272_v42 }
  0x4a   :  { %617 = vmatprep.subr.mxu0 %v271_v43 }
  0x4b   :  { %618 = vmatpush3.msra.mxu0 %v271_v43 }
  0x4c   :  { %619 = vmatprep.subr.mxu0 %v270_v44 }
  0x4d   :  { %620 = vmatpush3.msra.mxu0 %v270_v44 }
  0xed   :  { %v553_v35 = vpop.f32.mrf.mxu0 }
  0xee   :  { %v165_v36 = vadd.f32 %v553_v35, %v477_v34 }
  0xef   :  { %v159_v37 = vpop.f32.mrf.mxu0 }
  0xf0   :  { %v160_v38 = vadd.f32 %v477_v34, %v159_v37  ;;  %v169_v40 = vmax.f32 %v165_v36, 0.0 }
  0xf2   :  { %v168_v39 = vmax.f32 %v160_v38, 0.0 }
  0xf4   :  { %586 = vmatprep.mubr.f32.mxu1 %v168_v39 }
  0xf5   :  { %587 = vmatmul.mubr.f32.vlgmr.msra.gmra.mxu1 %v169_v40 }
  0xf6   :  { %625 = vmatpush3.msra.mxu1 %v385_v45 }
  0xf7   :  { %626 = vmatprep.subr.mxu1 %v384_v46 }
  0xf8   :  { %627 = vmatpush3.msra.mxu1 %v384_v46 }
  0xf9   :  { %628 = vmatprep.subr.mxu1 %v383_v47 }
  0xfa   :  { %629 = vmatpush3.msra.mxu1 %v383_v47 }
  0xfb   :  { %630 = vmatprep.subr.mxu1 %v382_v48 }
  0xfc   :  { %631 = vmatpush3.msra.mxu1 %v382_v48 }
  0xfd   :  { %632 = vmatprep.subr.mxu1 %v381_v49 }
  0xfe   :  { %633 = vmatpush3.msra.mxu1 %v381_v49 }
  0xff   :  { %634 = vmatprep.subr.mxu1 %v380_v50 }
 0x100   :  { %635 = vmatpush3.msra.mxu1 %v380_v50 }
 0x101   :  { %636 = vmatprep.subr.mxu1 %v379_v51 }
 0x102   :  { %637 = vmatpush3.msra.mxu1 %v379_v51 }
 0x103   :  { %638 = vmatprep.subr.mxu1 %v378_v52 }
 0x104   :  { %639 = vmatpush3.msra.mxu1 %v378_v52 }
 0x105   :  { %640 = vmatprep.subr.mxu1 %v377_v53 }
 0x106   :  { %641 = vmatpush3.msra.mxu1 %v377_v53 }
 0x107   :  { %642 = vmatprep.subr.mxu1 %v376_v54 }
 0x108   :  { %643 = vmatpush3.msra.mxu1 %v376_v54 }
 0x109   :  { %644 = vmatprep.subr.mxu1 %v375_v55 }
 0x10a   :  { %645 = vmatpush3.msra.mxu1 %v375_v55 }
 0x10b   :  { %646 = vmatprep.subr.mxu1 %v374_v56 }
 0x10c   :  { %647 = vmatpush3.msra.mxu1 %v374_v56 }
 0x10d   :  { %648 = vmatprep.subr.mxu1 %v373_v0 }
 0x10e   :  { %649 = vmatpush3.msra.mxu1 %v373_v0 }
 0x10f   :  { %650 = vmatprep.subr.mxu1 %v372_v1 }
 0x110   :  { %651 = vmatpush3.msra.mxu1 %v372_v1 }
 0x111   :  { %652 = vmatprep.subr.mxu1 %v371_v2 }
 0x112   :  { %653 = vmatpush3.msra.mxu1 %v371_v2 }
 0x113   :  { %654 = vmatprep.subr.mxu1 %v370_v3 }
 0x114   :  { %655 = vmatpush3.msra.mxu1 %v370_v3 }
 0x1b5   :  { %v588_v58 = vpop.f32.mrf.mxu1 }
 0x1b6   :  { %v265_v59 = vadd.f32 %v588_v58, %v480_v57 }
 0x1b7   :  { %v259_v60 = vpop.f32.mrf.mxu1 }
 0x1b8   :  { %v260_v61 = vadd.f32 %v480_v57, %v259_v60  ;;  %v269_v63 = vmax.f32 %v265_v59, 0.0 }
 0x1ba   :  { %v268_v62 = vmax.f32 %v260_v61, 0.0 }
 0x1bc   :  { %621 = vmatprep.mubr.f32.mxu0 %v268_v62 }
 0x1bd   :  { %622 = vmatmul.mubr.f32.vlgmr.msra.gmra.mxu0 %v269_v63 }
 0x27d   :  { %v623_v5 = vpop.f32.mrf.mxu0 }
 0x27e   :  { %v365_v6 = vadd.f32 %v623_v5, %v481_v4 }
 0x27f   :  { %v359_v7 = vpop.f32.mrf.mxu0 }
 0x280   :  { %v360_v8 = vadd.f32 %v481_v4, %v359_v7  ;;  %v369_v10 = vmax.f32 %v365_v6, 0.0 }
 0x282   :  { %v368_v9 = vmax.f32 %v360_v8, 0.0 }
 0x284   :  { %656 = vmatprep.mubr.f32.mxu1 %v368_v9 }
 0x285   :  { %657 = vmatmul.mubr.f32.vlgmr.msra.gmra.mxu1 %v369_v10 }
 0x345   :  { %v658_v12 = vpop.f32.mrf.mxu1 }
 0x346   :  { %v465_v13 = vadd.f32 %v658_v12, %v482_v11 }
 0x347   :  { %v459_v14 = vpop.f32.mrf.mxu1 }
 0x348   :  { %470 = vst.msk [vmem:[%s917_s9 + $0x8] sm:$0xff] %vm468_vm1, %v465_v13  ;;  %v460_v15 = vadd.f32 %v482_v11, %v459_v14 }
 0x34a   :  { %469 = vst.msk [vmem:[%s917_s9] sm:$0xff] %vm468_vm1, %v460_v15 }
 0x34b   :  { %475 = vsyncpa [#allocation3], 1 }
 0x34c   :  { %476 = vsyncpa [#allocation5], 1 }

</bundles_post_ra>
